<compile_context>
chip_gen: v7x
topology: tpu7x:2x2x1
jax: 0.10.0
libtpu: 0.0.40
codegen_flags: <defaults>
</compile_context>

<pallas_src>
import jax
import jax.numpy as jnp
from jax.experimental import pallas as pl
from jax.experimental.pallas import tpu as pltpu

IN_F = 7
HID_F = 8
OUT_F = 7


def encoder_kernel(x_ref, w1_ref, b1_ref, w2_ref, b2_ref, o_ref):
    # x_ref : (7, TB)  float32   (features x batch-tile, lane-dense)
    # w1_ref: (8, 7)   float32   (PyTorch layout: out x in)
    # b1_ref: (8, 1)   float32
    # w2_ref: (7, 8)   float32
    # b2_ref: (7, 1)   float32
    # o_ref : (7, TB)  float32
    x = x_ref[...]

    # Linear(7 -> 8):  H = W1 @ X + b1
    h = jnp.dot(w1_ref[...], x, preferred_element_type=jnp.float32) + b1_ref[...]

    # LeakyReLU(negative_slope=0.2)
    h = jnp.where(h > 0, h, 0.2 * h)

    # Linear(8 -> 7):  Y = W2 @ H + b2
    y = jnp.dot(w2_ref[...], h, preferred_element_type=jnp.float32) + b2_ref[...]

    o_ref[...] = y.astype(o_ref.dtype)


def _round_up(n, m):
    return ((n + m - 1) // m) * m


def encoder_forward(x, w1, b1, w2, b2, *, tile_b=2048):
    """x: (B, 7) float32.  w1:(8,7) b1:(8,) w2:(7,8) b2:(7,).  Returns (B, 7) float32."""
    B = x.shape[0]

    # Tile size on the lane (batch) axis: large multiple of 128, clipped for tiny batches.
    TB = tile_b if B >= tile_b else _round_up(max(B, 1), 128)
    Bp = _round_up(B, TB)

    # Lane-dense layout: (features, batch), batch padded to a multiple of TB.
    xt = jnp.transpose(x)  # (7, B)
    if Bp != B:
        xt = jnp.pad(xt, ((0, 0), (0, Bp - B)))

    b1c = b1.reshape(HID_F, 1)
    b2c = b2.reshape(OUT_F, 1)

    grid = (Bp // TB,)

    out_t = pl.pallas_call(
        encoder_kernel,
        out_shape=jax.ShapeDtypeStruct((OUT_F, Bp), jnp.float32),
        grid=grid,
        in_specs=[
            # Activations: stream batch tiles.
            pl.BlockSpec((IN_F, TB), lambda i: (0, i)),
            # Parameters: constant index_map -> stay resident in VMEM across steps.
            pl.BlockSpec((HID_F, IN_F), lambda i: (0, 0)),
            pl.BlockSpec((HID_F, 1), lambda i: (0, 0)),
            pl.BlockSpec((OUT_F, HID_F), lambda i: (0, 0)),
            pl.BlockSpec((OUT_F, 1), lambda i: (0, 0)),
        ],
        out_specs=pl.BlockSpec((OUT_F, TB), lambda i: (0, i)),
        compiler_params=pltpu.CompilerParams(
            dimension_semantics=("parallel",),
        ),
    )(xt, w1, b1c, w2, b2c)

    # Back to PyTorch (batch, features) layout; drop padding.
    return jnp.transpose(out_t[:, :B])


def init_params(key):
    """Deterministic init matching PyTorch Linear's default uniform(-1/sqrt(in), 1/sqrt(in)).
    Weights kept in PyTorch layout: W (out, in), b (out,)."""
    k1, k2, k3, k4 = jax.random.split(key, 4)
    bound1 = 1.0 / jnp.sqrt(float(IN_F))
    bound2 = 1.0 / jnp.sqrt(float(HID_F))
    w1 = jax.random.uniform(k1, (HID_F, IN_F), jnp.float32, -bound1, bound1)
    b1 = jax.random.uniform(k2, (HID_F,), jnp.float32, -bound1, bound1)
    w2 = jax.random.uniform(k3, (OUT_F, HID_F), jnp.float32, -bound2, bound2)
    b2 = jax.random.uniform(k4, (OUT_F,), jnp.float32, -bound2, bound2)
    return w1, b1, w2, b2


def encoder_ref(x, w1, b1, w2, b2):
    """Pure-JAX reference with identical semantics to the PyTorch module."""
    h = x @ w1.T + b1[None, :]
    h = jnp.where(h > 0, h, 0.2 * h)
    return h @ w2.T + b2[None, :]


if __name__ == "__main__":
    key = jax.random.PRNGKey(0)
    k_x, k_p, k_x2 = jax.random.split(key, 3)

    w1, b1, w2, b2 = init_params(k_p)

    # Small, dataset-consistent shape (COMPAS features -> 7 columns).
    batch = 8
    x = jax.random.normal(k_x, (batch, IN_F), jnp.float32)

    out = encoder_forward(x, w1, b1, w2, b2)
    out = jax.block_until_ready(out)

    ref = encoder_ref(x, w1, b1, w2, b2)
    assert out.shape == (batch, IN_F)
    assert jnp.allclose(out, ref, atol=1e-5, rtol=1e-5)

    # Exercise the tiled / padded path (grid > 1, B not a tile multiple).
    batch2 = 300
    x2 = jax.random.normal(k_x2, (batch2, IN_F), jnp.float32)
    out2 = jax.block_until_ready(encoder_forward(x2, w1, b1, w2, b2, tile_b=128))
    ref2 = encoder_ref(x2, w1, b1, w2, b2)
    assert out2.shape == (batch2, IN_F)
    assert jnp.allclose(out2, ref2, atol=1e-5, rtol=1e-5)

    print("KERNEL_OK")
</pallas_src>

<mosaic_0001>
module attributes {stable_mosaic.version = 11 : i64} {
  func.func @encoder_kernel(%arg0: i32, %arg1: memref<7x128xf32, #tpu.memory_space<vmem>>, %arg2: memref<8x7xf32, #tpu.memory_space<vmem>>, %arg3: memref<8x1xf32, #tpu.memory_space<vmem>>, %arg4: memref<7x8xf32, #tpu.memory_space<vmem>>, %arg5: memref<7x1xf32, #tpu.memory_space<vmem>>, %arg6: memref<7x128xf32, #tpu.memory_space<vmem>>) attributes {dimension_semantics = [#tpu.dimension_semantics<parallel>], iteration_bounds = array<i64: 1>, scalar_prefetch = 0 : i64, scratch_operands = 0 : i64, tpu.core_type = #tpu.core_type<tc>, window_params = [{transform_indices = @transform_0, window_bounds = array<i64: 7, 128>}, {pipeline_mode = #tpu.pipeline_mode<synchronous>, transform_indices = @transform_1, window_bounds = array<i64: 8, 7>}, {pipeline_mode = #tpu.pipeline_mode<synchronous>, transform_indices = @transform_2, window_bounds = array<i64: 8, 1>}, {pipeline_mode = #tpu.pipeline_mode<synchronous>, transform_indices = @transform_3, window_bounds = array<i64: 7, 8>}, {pipeline_mode = #tpu.pipeline_mode<synchronous>, transform_indices = @transform_4, window_bounds = array<i64: 7, 1>}, {transform_indices = @transform_5, window_bounds = array<i64: 7, 128>}]} {
    %c0 = arith.constant 0 : index
    %c0_0 = arith.constant 0 : index
    %0 = vector.load %arg1[%c0, %c0_0] : memref<7x128xf32, #tpu.memory_space<vmem>>, vector<7x128xf32>
    %c0_1 = arith.constant 0 : index
    %c0_2 = arith.constant 0 : index
    %1 = vector.load %arg2[%c0_1, %c0_2] : memref<8x7xf32, #tpu.memory_space<vmem>>, vector<8x7xf32>
    %cst = arith.constant dense<0.000000e+00> : vector<8x128xf32>
    %2 = tpu.matmul %1, %0, %cst {dimension_numbers = #tpu.dot_dimension_numbers<[1], [0], [0], [1], [0, 0, 1, 1], [], []>} : vector<8x7xf32>, vector<7x128xf32>, vector<8x128xf32> -> vector<8x128xf32>
    %c0_3 = arith.constant 0 : index
    %c0_4 = arith.constant 0 : index
    %3 = vector.load %arg3[%c0_3, %c0_4] : memref<8x1xf32, #tpu.memory_space<vmem>>, vector<8x1xf32>
    %4 = vector.broadcast %3 : vector<8x1xf32> to vector<8x128xf32>
    %5 = arith.addf %2, %4 : vector<8x128xf32>
    %cst_5 = arith.constant 0.000000e+00 : f32
    %6 = vector.broadcast %cst_5 : f32 to vector<8x128xf32>
    %7 = arith.cmpf ogt, %5, %6 : vector<8x128xf32>
    %cst_6 = arith.constant 2.000000e-01 : f32
    %8 = vector.broadcast %cst_6 : f32 to vector<8x128xf32>
    %9 = arith.mulf %8, %5 : vector<8x128xf32>
    %10 = arith.select %7, %5, %9 : vector<8x128xi1>, vector<8x128xf32>
    %c0_7 = arith.constant 0 : index
    %c0_8 = arith.constant 0 : index
    %11 = vector.load %arg4[%c0_7, %c0_8] : memref<7x8xf32, #tpu.memory_space<vmem>>, vector<7x8xf32>
    %cst_9 = arith.constant dense<0.000000e+00> : vector<7x128xf32>
    %12 = tpu.matmul %11, %10, %cst_9 {dimension_numbers = #tpu.dot_dimension_numbers<[1], [0], [0], [1], [0, 0, 1, 1], [], []>} : vector<7x8xf32>, vector<8x128xf32>, vector<7x128xf32> -> vector<7x128xf32>
    %c0_10 = arith.constant 0 : index
    %c0_11 = arith.constant 0 : index
    %13 = vector.load %arg5[%c0_10, %c0_11] : memref<7x1xf32, #tpu.memory_space<vmem>>, vector<7x1xf32>
    %14 = vector.broadcast %13 : vector<7x1xf32> to vector<7x128xf32>
    %15 = arith.addf %12, %14 : vector<7x128xf32>
    %c0_12 = arith.constant 0 : index
    %c0_13 = arith.constant 0 : index
    %16 = vector.load %arg6[%c0_12, %c0_13] : memref<7x128xf32, #tpu.memory_space<vmem>>, vector<7x128xf32>
    tpu.vector_store %arg6[%c0_12, %c0_13], %15 {strides = array<i32>} : memref<7x128xf32, #tpu.memory_space<vmem>>, vector<7x128xf32>,
    return
  }
  func.func @transform_0(%arg0: i32) -> (i32, i32) {
    %c0_i32 = arith.constant 0 : i32
    %c0_i32_0 = arith.constant 0 : i32
    return %c0_i32, %arg0 : i32, i32
  }
  func.func @transform_1(%arg0: i32) -> (i32, i32) {
    %c0_i32 = arith.constant 0 : i32
    %c0_i32_0 = arith.constant 0 : i32
    %c0_i32_1 = arith.constant 0 : i32
    return %c0_i32, %c0_i32_0 : i32, i32
  }
  func.func @transform_2(%arg0: i32) -> (i32, i32) {
    %c0_i32 = arith.constant 0 : i32
    %c0_i32_0 = arith.constant 0 : i32
    %c0_i32_1 = arith.constant 0 : i32
    return %c0_i32, %c0_i32_0 : i32, i32
  }
  func.func @transform_3(%arg0: i32) -> (i32, i32) {
    %c0_i32 = arith.constant 0 : i32
    %c0_i32_0 = arith.constant 0 : i32
    %c0_i32_1 = arith.constant 0 : i32
    return %c0_i32, %c0_i32_0 : i32, i32
  }
  func.func @transform_4(%arg0: i32) -> (i32, i32) {
    %c0_i32 = arith.constant 0 : i32
    %c0_i32_0 = arith.constant 0 : i32
    %c0_i32_1 = arith.constant 0 : i32
    return %c0_i32, %c0_i32_0 : i32, i32
  }
  func.func @transform_5(%arg0: i32) -> (i32, i32) {
    %c0_i32 = arith.constant 0 : i32
    %c0_i32_0 = arith.constant 0 : i32
    return %c0_i32, %arg0 : i32, i32
  }
}

</mosaic_0001>

<bundles_post_ra>
// kernel: tpu_custom_call.1
= control target key start
LH: loop header
LB: loop body
LE: loop exit
PB: predicated region body
PF: predicated region fallthrough
CT: control target
= control target key end

     0   :  { %vm33_vm0 = vcmask 1046528   ;;  %v252_v2 = vmov 0.0   ;;  %vm253_vm1 = vmmov 0   ;;  %vm29_vm2 = vcmask 56320   ;;  %s313_s0 = inlined_call_operand.vmem [shape: f32[7,128], index: 0, kind: input, shape index: {}]   ;;  %s314_s1 = inlined_call_operand.vmem [shape: f32[8,7], index: 1, kind: input, shape index: {}]   ;;  %s315_s2 = inlined_call_operand.vmem [shape: f32[8,1], index: 2, kind: input, shape index: {}]   ;;  %s316_s3 = inlined_call_operand.vmem [shape: f32[7,8], index: 3, kind: input, shape index: {}]   ;;  %s317_s4 = inlined_call_operand.vmem [shape: f32[7,1], index: 4, kind: input, shape index: {}]   ;;  %s318_s5 = inlined_call_operand.hbm [shape: f32[7,128], index: 5, kind: output, shape index: {}]  }
   0x1   :  { %v21_v0 = vld [vmem:[%s313_s0] sm:$0x7f]  ;;  %213 = vmatprep.subr.mxu0 %v252_v2  ;;  %215 = vmatprep.mubr.msk.f32.mxu0 %vm253_vm1, %v252_v2  ;;  %v254_v4 = vmov 0  }
   0x2   :  { %v22_v1 = vld [vmem:[%s314_s1] sm:$0xff]  ;;  %214 = vmatpush3.msk.msra.mxu0 %vm33_vm0, %v21_v0  ;;  %227 = vset.pattern.permute.xlu0 %v254_v4 }
   0x3   :  { %v23_v3 = vld [vmem:[%s315_s2] sm:$0xff] }
   0x4   :  { %10 = vsyncpa [#allocation3], 0  ;;  %216 = vmatmul.mubr.msk.f32.vlgmr.msra.gmra.mrb[0].mxu0 %vm29_vm2, %v22_v1  ;;  %26 = vperm.xlu0 %227, %v23_v3   ;;  %v111_v5 = vld [vmem:[%s317_s4] sm:$0x7f]  ;;  %vm117_vm4 = vcmask 64512   ;;  %s255_s25 = smov [#allocation2]  }
   0x5   :  { %218 = vmatprep.subr.mxu1 %v252_v2  ;;  %220 = vmatprep.mubr.msk.f32.mxu1 %vm253_vm1, %v252_v2  ;;  %v110_v11 = vld [vmem:[%s316_s3] sm:$0x7f]  ;;  %s198_s26 = sshll.u32 %s255_s25, 4  ;;  %s199_s26 = int_to_ptr.vmem [resolvable:$true] %s198_s26 }
   0x6   :  { %s228_s4 = scalar_lea.vmem %s199_s26, 128  ;;  %p233_p1 = scmp.lt.s32.totalorder %s199_s26, %s199_s26 }
   0x7   :  { %p229_p0 = scmp.ne.s32.totalorder %s199_s26, %s228_s4  ;;  %p234_p2 = scmp.lt.s32.totalorder %s228_s4, %s228_s4 }
   0x8   :  { %114 = vperm.xlu0 %227, %v111_v5  }
   0x9   :  { %p235_p3 = por %p234_p2, %p233_p1 }
   0xb   :  { %p236_p4 = pnand %p235_p3, %p229_p0 }
  0x83   :  { %v27_v6 = vpop.permute.xlu0 %26 }
  0x87   :  { %v115_v13 = vpop.permute.xlu0 %114 }
  0xd7   :  { %v103_v7 = vpop.f32.mrb[0].mxu0 }
  0xd8   :  { %v104_v8 = vadd.f32 %v103_v7, %v27_v6  ;;  %v217_v9 = vpop.f32.mrb[1].mxu0 }
  0xda   :  { %vm107_vm3 = vcmp.gt.f32.partialorder %v104_v8, 0.0  ;;  %v108_v10 = vmul.f32 0.2, %v104_v8 }
  0xdc   :  { %v109_v12 = vsel %vm107_vm3, %v104_v8, %v108_v10 }
  0xdd   :  { %219 = vmatpush3.msra.mxu1 %v109_v12 }
  0xde   :  { %221 = vmatmul.mubr.msk.f32.vlgmr.msra.gmra.mrb[0].mxu1 %vm117_vm4, %v110_v11 }
 0x1b1   :  { %v187_v14 = vpop.f32.mrb[0].mxu1 }
 0x1b2   :  { %v188_v15 = vadd.f32 %v187_v14, %v115_v13  ;;  %v222_v16 = vpop.f32.mrb[1].mxu1 }
 0x1b4   :  { %191 = vst [vmem:[#allocation2] sm:$0x7f] %v188_v15 }
 0x1b5   :  { %239 = shalt.err (!%p236_p4)
}
 0x1b6   :  { %s240_s28 = scalar_lea.hbm %s318_s5, 128 }
 0x1b7   :  { %p241_p5 = scmp.ne.s32.totalorder %s318_s5, %s240_s28  ;;  %p244_p6 = scmp.lt.u32.totalorder %s240_s28, %s318_s5 }
 0x1b9   :  { %p246_p7 = pnand %p244_p6, %p241_p5 }
 0x1bb   :  { %249 = shalt.err (!%p246_p7)
}
 0x1bc   :  { %201 = dma.vmem_to_hbm [thread:$0]  %s199_s26, 128, %s318_s5, [#allocation3]  }
 0x1bd   :  { %250 = dma.done.wait [#allocation3], 128  }
 0x1be   :  { %251 = vsyncadd [#allocation3], 4294967168 }
 0x1bf   :  { %205 = vsyncpa [#allocation3], 1 }

</bundles_post_ra>
